<compile_context>
chip_gen: v5e
topology: v5e:2x2
jax: 0.10.0
libtpu: 0.0.40
codegen_flags: <defaults>
</compile_context>

<pallas_src>
import functools
import inspect

import jax
import jax.numpy as jnp
from jax import lax
from jax.experimental import pallas as pl
from jax.experimental.pallas import tpu as pltpu

_MIB = 1024 * 1024


def _round_up(x, m):
    return (x + m - 1) // m * m


def _row_multiple(dtype):
    # Sub-32-bit dtypes pack 2 (bf16) / 4 (int8, fp8) rows per sublane.
    return {4: 8, 2: 16, 1: 32}.get(jnp.dtype(dtype).itemsize, 8)


def _vmem_capacity_bytes():
    try:
        return int(pltpu.get_tpu_info().vmem_capacity_bytes)
    except Exception:
        return 128 * _MIB  # v5e/v6e default if the query is unavailable


try:
    _PIPELINE_MODE_SUPPORTED = (
        hasattr(pl, "Buffered")
        and "pipeline_mode" in inspect.signature(pl.BlockSpec).parameters
    )
except Exception:
    _PIPELINE_MODE_SUPPORTED = False


# ---------------------------------------------------------------------------
# Kernels
# ---------------------------------------------------------------------------

def _residual_layer_norm(x, y, p_ref, o_ref, *, eps, d_model, lanes_padded):
    """out = LayerNorm(x + y + b2) * gamma + beta, all in f32."""
    p = p_ref[...].astype(jnp.float32)           # (3, d_model_p): b2, gamma, beta
    z = x.astype(jnp.float32) + y + p[0:1, :]    # residual + second bias
    inv_d = 1.0 / d_model
    # Padded lanes of x / y / b2 are zero, so the unmasked sum / d_model is exact.
    mean = jnp.sum(z, axis=-1, keepdims=True) * inv_d
    if lanes_padded:
        col = lax.broadcasted_iota(jnp.int32, z.shape, 1)
        zc = jnp.where(col < d_model, z - mean, 0.0)
    else:
        zc = z - mean
    var = jnp.sum(zc * zc, axis=-1, keepdims=True) * inv_d
    norm = zc * lax.rsqrt(var + eps)
    o_ref[...] = (norm * p[1:2, :] + p[2:3, :]).astype(o_ref.dtype)


def _ffn_kernel_resident(x_ref, w1_ref, b1_ref, w2_ref, p_ref, o_ref, *,
                         eps, d_model, lanes_padded):
    """Weights fully VMEM-resident: one row tile per grid step, no scratch."""
    x = x_ref[...]
    x_mm = x if x.dtype == w1_ref.dtype else x.astype(w1_ref.dtype)
    h = jnp.dot(x_mm, w1_ref[...], preferred_element_type=jnp.float32)
    h = jnp.maximum(h + b1_ref[...].astype(jnp.float32), 0.0)
    h = h.astype(w2_ref.dtype)
    y = jnp.dot(h, w2_ref[...], preferred_element_type=jnp.float32)
    # dropout == identity at inference.
    # TODO(synk): training-mode dropout would use pltpu.prng_seed / prng_random_bits.
    _residual_layer_norm(x, y, p_ref, o_ref, eps=eps, d_model=d_model,
                         lanes_padded=lanes_padded)


def _ffn_kernel_tiled(x_ref, w1_ref, b1_ref, w2_ref, p_ref, o_ref, acc_ref, *,
                      eps, d_model, lanes_padded):
    """d_inner tiled along grid axis 1 with an f32 VMEM accumulator."""
    k = pl.program_id(1)
    x = x_ref[...]
    x_mm = x if x.dtype == w1_ref.dtype else x.astype(w1_ref.dtype)
    h = jnp.dot(x_mm, w1_ref[...], preferred_element_type=jnp.float32)
    h = jnp.maximum(h + b1_ref[...].astype(jnp.float32), 0.0)
    h = h.astype(w2_ref.dtype)
    y = jnp.dot(h, w2_ref[...], preferred_element_type=jnp.float32)

    @pl.when(k == 0)
    def _first():
        acc_ref[...] = y            # overwrite: no zero-fill + RMW at k == 0

    @pl.when(k > 0)
    def _accumulate():
        acc_ref[...] += y

    @pl.when(k == pl.num_programs(1) - 1)
    def _finalize():
        _residual_layer_norm(x, acc_ref[...], p_ref, o_ref, eps=eps,
                             d_model=d_model, lanes_padded=lanes_padded)


# ---------------------------------------------------------------------------
# Parameter preparation (do this once at init time, not per forward call)
# ---------------------------------------------------------------------------

def prepare_ffn_params(w1, b1, w2, b2, gamma, beta, *, param_dtype=None):
    """Pad / stack the FFN parameters once.

    w1: (d_model, d_inner), b1: (d_inner,)   (nn.Linear weights pre-transposed)
    w2: (d_inner, d_model), b2: (d_model,)
    gamma, beta: (d_model,) LayerNorm affine.
    param_dtype: optionally cast the matmul weights once (e.g. jnp.bfloat16 on
      v5e, whose MXU is bf16-native and ~3x slower on f32 operands).
    """
    d_model, d_inner = w1.shape
    assert w2.shape == (d_inner, d_model)
    if param_dtype is not None:
        w1 = w1.astype(param_dtype)
        w2 = w2.astype(param_dtype)
    d_model_p = _round_up(d_model, 128)
    d_inner_p = _round_up(d_inner, 128)

    def pad2(a, rows, cols):
        if a.shape == (rows, cols):
            return a                     # already aligned -> no HBM copy
        return jnp.pad(a, ((0, rows - a.shape[0]), (0, cols - a.shape[1])))

    w1p = pad2(w1, d_model_p, d_inner_p)
    w2p = pad2(w2, d_inner_p, d_model_p)
    b1p = pad2(b1.reshape(1, d_inner), 1, d_inner_p)
    # Stack b2 / gamma / beta into one small f32 block -> one BlockSpec / DMA.
    pstack = pad2(jnp.stack([b2, gamma, beta]).astype(jnp.float32), 3, d_model_p)
    return (w1p, b1p, w2p, pstack, d_model)


# ---------------------------------------------------------------------------
# Tile-plan selection (per-generation roofline / VMEM capacity decisions)
# ---------------------------------------------------------------------------

def _choose_tiles(M, d_model_p, d_inner_p, x_dtype, w_dtype, *, tm, tk,
                  budget, small_vmem, single_buffered_params):
    row_mult = _row_multiple(x_dtype)
    xb = jnp.dtype(x_dtype).itemsize
    wb = jnp.dtype(w_dtype).itemsize
    pbuf = 1 if single_buffered_params else 2

    def clamp_tm(t):
        return max(row_mult, _round_up(min(t, _round_up(M, row_mult)), row_mult))

    def resident_bytes(tm_e):
        return (4 * tm_e * d_model_p * xb                       # x + out, dbl-buf
                + pbuf * 2 * d_model_p * d_inner_p * wb         # w1 + w2 resident
                + pbuf * 8 * d_inner_p * wb                     # b1 (sublane-padded)
                + pbuf * 8 * d_model_p * 4                      # b2/gamma/beta
                + tm_e * d_inner_p * 4                          # hidden activation
                + 2 * tm_e * d_model_p * 4)                     # epilogue temps

    def tiled_bytes(tm_e, tk_e):
        return (4 * tm_e * d_model_p * xb
                + 2 * 2 * d_model_p * tk_e * wb                 # w1/w2 tiles, dbl-buf
                + 2 * 8 * tk_e * wb                             # b1 tile
                + pbuf * 8 * d_model_p * 4
                + tm_e * d_model_p * 4                          # acc scratch
                + tm_e * tk_e * 4                               # hidden tile
                + 2 * tm_e * d_model_p * 4)

    # d_inner tile candidates: divisors of d_inner_p that are 128-multiples.
    cands = [c for c in range(d_inner_p, 127, -128) if d_inner_p % c == 0]

    if tk is not None:
        # Honor an explicit request, snapped to a valid (>=128) divisor.
        tk_req = max(128, _round_up(tk, 128))
        fit = [c for c in cands if c <= tk_req]
        tk_e = fit[0] if fit else cands[-1]
        if tk_e == d_inner_p:
            tm_e = clamp_tm(tm if tm is not None else 256)
        else:
            tm_e = clamp_tm(tm if tm is not None else (512 if small_vmem else 768))
        return tm_e, tk_e

    # Auto: prefer fully-resident weights (MXU-bound, no weight re-streaming).
    tm_res = clamp_tm(tm if tm is not None else 256)
    if resident_bytes(tm_res) <= budget:
        return tm_res, d_inner_p

    # Otherwise tile d_inner: 256-multiple tiles (2x256x256 MXU) and a large tm
    # so the re-streamed weights stay below the HBM roofline.
    tm_candidates = ([tm] if tm is not None
                     else ([512, 384, 256] if small_vmem
                           else [768, 640, 512, 384, 256]))
    pref = ([c for c in cands if c % 256 == 0 and c < d_inner_p]
            or [c for c in cands if c < d_inner_p] or cands)
    for tm_c in tm_candidates:
        tm_e = clamp_tm(tm_c)
        for tk_e in pref:
            if tiled_bytes(tm_e, tk_e) <= budget:
                return tm_e, tk_e
    # Nothing fits the budget cleanly: smallest plan, let the compiler cope.
    return clamp_tm(tm_candidates[-1]), pref[-1]


# ---------------------------------------------------------------------------
# Forward pass
# ---------------------------------------------------------------------------

def ffn_apply(x, params, *, eps=1e-6, tm=None, tk=None,
              vmem_limit_bytes=None, single_buffer_params=True):
    """x: (..., d_model) -> (..., d_model) with pre-prepared params."""
    w1p, b1p, w2p, pstack, d_model = params
    assert x.shape[-1] == d_model
    orig_shape = x.shape
    d_model_p, d_inner_p = w1p.shape
    M = 1
    for s in x.shape[:-1]:
        M *= s
    lanes_padded = d_model_p != d_model

    vmem_cap = _vmem_capacity_bytes()
    small_vmem = vmem_cap <= 96 * _MIB              # v7x: 64 MiB per TensorCore
    if vmem_limit_bytes is None:
        vmem_limit_bytes = 56 * _MIB if small_vmem else 100 * _MIB
    budget = int(vmem_limit_bytes * 0.85)           # headroom for Mosaic scratch

    single_buffer_ok = bool(single_buffer_params) and _PIPELINE_MODE_SUPPORTED

    tm_eff, tk_eff = _choose_tiles(
        M, d_model_p, d_inner_p, x.dtype, w1p.dtype, tm=tm, tk=tk,
        budget=budget, small_vmem=small_vmem,
        single_buffered_params=single_buffer_ok)

    row_mult = _row_multiple(x.dtype)
    if tm is None and small_vmem and tm_eff >= M and M >= 2 * row_mult:
        # v7x: make sure both TensorCores get at least one row tile.
        tm_eff = _round_up((M + 1) // 2, row_mult)

    num_k = d_inner_p // tk_eff
    rows = pl.cdiv(M, tm_eff)     # ragged last tile handled by masked stores

    x2 = x.reshape(M, d_model)
    if lanes_padded:
        x2 = jnp.pad(x2, ((0, 0), (0, d_model_p - d_model)))

    flops = 4 * M * d_model * d_inner_p
    bytes_accessed = int(2 * M * d_model_p * x.dtype.itemsize
                         + (w1p.size + w2p.size) * w1p.dtype.itemsize
                         + b1p.size * b1p.dtype.itemsize + pstack.size * 4)
    cost = pl.CostEstimate(flops=flops, transcendentals=0,
                           bytes_accessed=bytes_accessed)

    def _build(use_single_buffer):
        def spec(shape, index_map, constant=False):
            if constant and use_single_buffer:
                return pl.BlockSpec(shape, index_map, pipeline_mode=pl.Buffered(1))
            return pl.BlockSpec(shape, index_map)

        if num_k == 1:
            grid = (rows,)
            kernel = functools.partial(_ffn_kernel_resident, eps=eps,
                                       d_model=d_model, lanes_padded=lanes_padded)
            in_specs = [
                pl.BlockSpec((tm_eff, d_model_p), lambda i: (i, 0)),          # x
                spec((d_model_p, d_inner_p), lambda i: (0, 0), True),         # w1
                spec((1, d_inner_p), lambda i: (0, 0), True),                 # b1
                spec((d_inner_p, d_model_p), lambda i: (0, 0), True),         # w2
                spec((3, d_model_p), lambda i: (0, 0), True),                 # b2/g/b
            ]
            out_specs = pl.BlockSpec((tm_eff, d_model_p), lambda i: (i, 0))
            scratch = []
            dims = ("parallel",)
        else:
            grid = (rows, num_k)
            kernel = functools.partial(_ffn_kernel_tiled, eps=eps,
                                       d_model=d_model, lanes_padded=lanes_padded)
            in_specs = [
                pl.BlockSpec((tm_eff, d_model_p), lambda i, k: (i, 0)),       # x
                pl.BlockSpec((d_model_p, tk_eff), lambda i, k: (0, k)),       # w1
                pl.BlockSpec((1, tk_eff), lambda i, k: (0, k)),               # b1
                pl.BlockSpec((tk_eff, d_model_p), lambda i, k: (k, 0)),       # w2
                spec((3, d_model_p), lambda i, k: (0, 0), True),              # b2/g/b
            ]
            out_specs = pl.BlockSpec((tm_eff, d_model_p), lambda i, k: (i, 0))
            scratch = [pltpu.VMEM((tm_eff, d_model_p), jnp.float32)]
            dims = ("parallel", "arbitrary")

        return pl.pallas_call(
            kernel,
            out_shape=jax.ShapeDtypeStruct((M, d_model_p), x.dtype),
            grid_spec=pltpu.PrefetchScalarGridSpec(
                num_scalar_prefetch=0, grid=grid,
                in_specs=in_specs, out_specs=out_specs,
                scratch_shapes=scratch),
            compiler_params=pltpu.CompilerParams(
                dimension_semantics=dims, vmem_limit_bytes=vmem_limit_bytes),
            cost_estimate=cost,
        )

    args = (x2, w1p, b1p, w2p, pstack)
    if single_buffer_ok:
        try:
            out = _build(True)(*args)
        except Exception:  # noqa: BLE001
            # Narrow intent: only the pl.Buffered(1) request is retried here.
            # Any genuine kernel error reproduces (and surfaces) on the
            # default-buffered path below instead of being hidden.
            out = _build(False)(*args)
    else:
        out = _build(False)(*args)

    if lanes_padded:
        out = out[:, :d_model]
    return out.reshape(orig_shape)


def positionwise_feed_forward(x, w1, b1, w2, b2, gamma, beta, *, eps=1e-6,
                              tm=None, tk=None, vmem_limit_bytes=None,
                              single_buffer_params=True):
    """Convenience wrapper: pads params per call. For repeated use, call
    prepare_ffn_params once and ffn_apply per step."""
    params = prepare_ffn_params(w1, b1, w2, b2, gamma, beta)
    return ffn_apply(x, params, eps=eps, tm=tm, tk=tk,
                     vmem_limit_bytes=vmem_limit_bytes,
                     single_buffer_params=single_buffer_params)


if __name__ == "__main__":
    key = jax.random.PRNGKey(0)
    keys = jax.random.split(key, 16)

    def reference(x, w1, b1, w2, b2, gamma, beta, eps=1e-6):
        xf = x.astype(jnp.float32)
        h = jnp.maximum(xf @ w1.astype(jnp.float32) + b1.astype(jnp.float32), 0.0)
        y = h @ w2.astype(jnp.float32) + b2.astype(jnp.float32)
        z = xf + y
        mu = z.mean(-1, keepdims=True)
        var = ((z - mu) ** 2).mean(-1, keepdims=True)
        return ((z - mu) / jnp.sqrt(var + eps) * gamma.astype(jnp.float32)
                + beta.astype(jnp.float32))

    # --- Test 1: module-sized f32 shapes (B=2, S=8, d_model=32, d_inner=64):
    #     lane-padded, weights resident, scratch-free kernel path. ---
    B, S, d_model, d_inner = 2, 8, 32, 64
    x = jax.random.normal(keys[0], (B, S, d_model), jnp.float32)
    w1 = jax.random.normal(keys[1], (d_model, d_inner), jnp.float32) * 0.1
    b1 = jax.random.normal(keys[2], (d_inner,), jnp.float32) * 0.1
    w2 = jax.random.normal(keys[3], (d_inner, d_model), jnp.float32) * 0.1
    b2 = jax.random.normal(keys[4], (d_model,), jnp.float32) * 0.1
    gamma = jnp.ones((d_model,), jnp.float32)
    beta = jnp.zeros((d_model,), jnp.float32)

    out = positionwise_feed_forward(x, w1, b1, w2, b2, gamma, beta)
    jax.block_until_ready(out)
    ref = reference(x, w1, b1, w2, b2, gamma, beta)
    assert out.shape == x.shape
    assert jnp.allclose(out, ref, atol=2e-4, rtol=2e-4), "f32 mismatch vs reference"

    # --- Test 2: bf16 with explicit d_inner tiling (tk=128 over d_inner=256)
    #     -> exercises the accumulator (num_k > 1) kernel path. ---
    B2, S2, dm2, di2 = 2, 64, 128, 256
    xb = jax.random.normal(keys[5], (B2, S2, dm2), jnp.float32).astype(jnp.bfloat16)
    w1b = (jax.random.normal(keys[6], (dm2, di2), jnp.float32) * 0.06).astype(jnp.bfloat16)
    b1b = (jax.random.normal(keys[7], (di2,), jnp.float32) * 0.05).astype(jnp.bfloat16)
    w2b = (jax.random.normal(keys[8], (di2, dm2), jnp.float32) * 0.06).astype(jnp.bfloat16)
    b2b = (jax.random.normal(keys[9], (dm2,), jnp.float32) * 0.05).astype(jnp.bfloat16)
    gammab = jnp.ones((dm2,), jnp.bfloat16)
    betab = jnp.zeros((dm2,), jnp.bfloat16)

    outb = positionwise_feed_forward(xb, w1b, b1b, w2b, b2b, gammab, betab,
                                     tm=128, tk=128)
    jax.block_until_ready(outb)
    refb = reference(xb, w1b, b1b, w2b, b2b, gammab, betab)
    assert jnp.allclose(outb.astype(jnp.float32), refb, atol=5e-2, rtol=5e-2), \
        "bf16 tiled mismatch vs reference"

    # --- Test 3: params prepared once + ragged row grid (M=80 rows, tm=48):
    #     no row padding in HBM; last row tile handled by masked stores. ---
    B3, S3, dm3, di3 = 2, 40, 128, 512
    xc = jax.random.normal(keys[10], (B3, S3, dm3), jnp.float32).astype(jnp.bfloat16)
    w1c = (jax.random.normal(keys[11], (dm3, di3), jnp.float32) * 0.05).astype(jnp.bfloat16)
    b1c = (jax.random.normal(keys[12], (di3,), jnp.float32) * 0.05).astype(jnp.bfloat16)
    w2c = (jax.random.normal(keys[13], (di3, dm3), jnp.float32) * 0.05).astype(jnp.bfloat16)
    b2c = (jax.random.normal(keys[14], (dm3,), jnp.float32) * 0.05).astype(jnp.bfloat16)
    gammac = jnp.ones((dm3,), jnp.bfloat16)
    betac = jnp.zeros((dm3,), jnp.bfloat16)

    prepared = prepare_ffn_params(w1c, b1c, w2c, b2c, gammac, betac)
    outc = ffn_apply(xc, prepared, tm=48)
    jax.block_until_ready(outc)
    refc = reference(xc, w1c, b1c, w2c, b2c, gammac, betac)
    assert outc.shape == xc.shape
    assert jnp.allclose(outc.astype(jnp.float32), refc, atol=5e-2, rtol=5e-2), \
        "bf16 ragged-row mismatch vs reference"

    print("KERNEL_OK")
</pallas_src>

<mosaic_0001>
module attributes {stable_mosaic.version = 11 : i64} {
  func.func @_ffn_kernel_resident(%arg0: i32, %arg1: memref<16x128xf32, #tpu.memory_space<vmem>>, %arg2: memref<128x128xf32, #tpu.memory_space<vmem>>, %arg3: memref<1x128xf32, #tpu.memory_space<vmem>>, %arg4: memref<128x128xf32, #tpu.memory_space<vmem>>, %arg5: memref<3x128xf32, #tpu.memory_space<vmem>>, %arg6: memref<16x128xf32, #tpu.memory_space<vmem>>) attributes {dimension_semantics = [#tpu.dimension_semantics<parallel>], iteration_bounds = array<i64: 1>, scalar_prefetch = 0 : i64, scratch_operands = 0 : i64, tpu.core_type = #tpu.core_type<tc>, window_params = [{transform_indices = @transform_0, window_bounds = array<i64: 16, 128>}, {pipeline_mode = #tpu.pipeline_mode<synchronous>, transform_indices = @transform_1, window_bounds = array<i64: 128, 128>}, {pipeline_mode = #tpu.pipeline_mode<synchronous>, transform_indices = @transform_2, window_bounds = array<i64: 1, 128>}, {pipeline_mode = #tpu.pipeline_mode<synchronous>, transform_indices = @transform_3, window_bounds = array<i64: 128, 128>}, {pipeline_mode = #tpu.pipeline_mode<synchronous>, transform_indices = @transform_4, window_bounds = array<i64: 3, 128>}, {transform_indices = @transform_5, window_bounds = array<i64: 16, 128>}]} {
    %c0 = arith.constant 0 : index
    %c0_0 = arith.constant 0 : index
    %0 = vector.load %arg1[%c0, %c0_0] : memref<16x128xf32, #tpu.memory_space<vmem>>, vector<16x128xf32>
    %c0_1 = arith.constant 0 : index
    %c0_2 = arith.constant 0 : index
    %1 = vector.load %arg2[%c0_1, %c0_2] : memref<128x128xf32, #tpu.memory_space<vmem>>, vector<128x128xf32>
    %cst = arith.constant dense<0.000000e+00> : vector<16x128xf32>
    %2 = tpu.matmul %0, %1, %cst {dimension_numbers = #tpu.dot_dimension_numbers<[1], [0], [0], [1], [0, 0, 1, 1], [], []>} : vector<16x128xf32>, vector<128x128xf32>, vector<16x128xf32> -> vector<16x128xf32>
    %c0_3 = arith.constant 0 : index
    %c0_4 = arith.constant 0 : index
    %3 = vector.load %arg3[%c0_3, %c0_4] : memref<1x128xf32, #tpu.memory_space<vmem>>, vector<1x128xf32>
    %4 = vector.broadcast %3 : vector<1x128xf32> to vector<16x128xf32>
    %5 = arith.addf %2, %4 : vector<16x128xf32>
    %cst_5 = arith.constant 0.000000e+00 : f32
    %6 = vector.broadcast %cst_5 : f32 to vector<16x128xf32>
    %7 = arith.maximumf %5, %6 : vector<16x128xf32>
    %c0_6 = arith.constant 0 : index
    %c0_7 = arith.constant 0 : index
    %8 = vector.load %arg4[%c0_6, %c0_7] : memref<128x128xf32, #tpu.memory_space<vmem>>, vector<128x128xf32>
    %cst_8 = arith.constant dense<0.000000e+00> : vector<16x128xf32>
    %9 = tpu.matmul %7, %8, %cst_8 {dimension_numbers = #tpu.dot_dimension_numbers<[1], [0], [0], [1], [0, 0, 1, 1], [], []>} : vector<16x128xf32>, vector<128x128xf32>, vector<16x128xf32> -> vector<16x128xf32>
    %c0_9 = arith.constant 0 : index
    %c0_10 = arith.constant 0 : index
    %10 = vector.load %arg5[%c0_9, %c0_10] : memref<3x128xf32, #tpu.memory_space<vmem>>, vector<3x128xf32>
    %11 = arith.addf %0, %9 : vector<16x128xf32>
    %12 = vector.extract_strided_slice %10 {offsets = [0, 0], sizes = [1, 128], strides = [1, 1]} : vector<3x128xf32> to vector<1x128xf32>
    %13 = vector.broadcast %12 : vector<1x128xf32> to vector<16x128xf32>
    %14 = arith.addf %11, %13 : vector<16x128xf32>
    %cst_11 = arith.constant dense<0.000000e+00> : vector<16xf32>
    %15 = vector.multi_reduction <add>, %14, %cst_11 [1] : vector<16x128xf32> to vector<16xf32>
    %16 = vector.shape_cast %15 : vector<16xf32> to vector<16x1xf32>
    %cst_12 = arith.constant 3.125000e-02 : f32
    %17 = vector.broadcast %cst_12 : f32 to vector<16x1xf32>
    %18 = arith.mulf %16, %17 : vector<16x1xf32>
    %19 = tpu.iota {dimensions = array<i32: 1>} : vector<16x128xi32>
    %c32_i32 = arith.constant 32 : i32
    %20 = vector.broadcast %c32_i32 : i32 to vector<16x128xi32>
    %21 = arith.cmpi slt, %19, %20 : vector<16x128xi32>
    %22 = vector.broadcast %18 : vector<16x1xf32> to vector<16x128xf32>
    %23 = arith.subf %14, %22 : vector<16x128xf32>
    %cst_13 = arith.constant 0.000000e+00 : f32
    %24 = vector.broadcast %cst_13 : f32 to vector<16x128xf32>
    %25 = arith.select %21, %23, %24 : vector<16x128xi1>, vector<16x128xf32>
    %26 = arith.mulf %25, %25 : vector<16x128xf32>
    %cst_14 = arith.constant dense<0.000000e+00> : vector<16xf32>
    %27 = vector.multi_reduction <add>, %26, %cst_14 [1] : vector<16x128xf32> to vector<16xf32>
    %28 = vector.shape_cast %27 : vector<16xf32> to vector<16x1xf32>
    %cst_15 = arith.constant 3.125000e-02 : f32
    %29 = vector.broadcast %cst_15 : f32 to vector<16x1xf32>
    %30 = arith.mulf %28, %29 : vector<16x1xf32>
    %cst_16 = arith.constant 9.99999997E-7 : f32
    %31 = vector.broadcast %cst_16 : f32 to vector<16x1xf32>
    %32 = arith.addf %30, %31 : vector<16x1xf32>
    %33 = math.rsqrt %32 : vector<16x1xf32>
    %34 = vector.broadcast %33 : vector<16x1xf32> to vector<16x128xf32>
    %35 = arith.mulf %25, %34 : vector<16x128xf32>
    %36 = vector.extract_strided_slice %10 {offsets = [1, 0], sizes = [1, 128], strides = [1, 1]} : vector<3x128xf32> to vector<1x128xf32>
    %37 = vector.broadcast %36 : vector<1x128xf32> to vector<16x128xf32>
    %38 = arith.mulf %35, %37 : vector<16x128xf32>
    %39 = vector.extract_strided_slice %10 {offsets = [2, 0], sizes = [1, 128], strides = [1, 1]} : vector<3x128xf32> to vector<1x128xf32>
    %40 = vector.broadcast %39 : vector<1x128xf32> to vector<16x128xf32>
    %41 = arith.addf %38, %40 : vector<16x128xf32>
    %c0_17 = arith.constant 0 : index
    %c0_18 = arith.constant 0 : index
    %42 = vector.load %arg6[%c0_17, %c0_18] : memref<16x128xf32, #tpu.memory_space<vmem>>, vector<16x128xf32>
    tpu.vector_store %arg6[%c0_17, %c0_18], %41 {strides = array<i32>} : memref<16x128xf32, #tpu.memory_space<vmem>>, vector<16x128xf32>,
    return
  }
  func.func @transform_0(%arg0: i32) -> (i32, i32) {
    %c0_i32 = arith.constant 0 : i32
    %c0_i32_0 = arith.constant 0 : i32
    return %arg0, %c0_i32 : i32, i32
  }
  func.func @transform_1(%arg0: i32) -> (i32, i32) {
    %c0_i32 = arith.constant 0 : i32
    %c0_i32_0 = arith.constant 0 : i32
    %c0_i32_1 = arith.constant 0 : i32
    return %c0_i32, %c0_i32_0 : i32, i32
  }
  func.func @transform_2(%arg0: i32) -> (i32, i32) {
    %c0_i32 = arith.constant 0 : i32
    %c0_i32_0 = arith.constant 0 : i32
    %c0_i32_1 = arith.constant 0 : i32
    return %c0_i32, %c0_i32_0 : i32, i32
  }
  func.func @transform_3(%arg0: i32) -> (i32, i32) {
    %c0_i32 = arith.constant 0 : i32
    %c0_i32_0 = arith.constant 0 : i32
    %c0_i32_1 = arith.constant 0 : i32
    return %c0_i32, %c0_i32_0 : i32, i32
  }
  func.func @transform_4(%arg0: i32) -> (i32, i32) {
    %c0_i32 = arith.constant 0 : i32
    %c0_i32_0 = arith.constant 0 : i32
    %c0_i32_1 = arith.constant 0 : i32
    return %c0_i32, %c0_i32_0 : i32, i32
  }
  func.func @transform_5(%arg0: i32) -> (i32, i32) {
    %c0_i32 = arith.constant 0 : i32
    %c0_i32_0 = arith.constant 0 : i32
    return %arg0, %c0_i32 : i32, i32
  }
}

module attributes {stable_mosaic.version = 11 : i64} {
  func.func @_ffn_kernel_resident(%arg0: i32, %arg1: memref<16x128xf32, #tpu.memory_space<vmem>>, %arg2: memref<128x128xf32, #tpu.memory_space<vmem>>, %arg3: memref<1x128xf32, #tpu.memory_space<vmem>>, %arg4: memref<128x128xf32, #tpu.memory_space<vmem>>, %arg5: memref<3x128xf32, #tpu.memory_space<vmem>>, %arg6: memref<16x128xf32, #tpu.memory_space<vmem>>) attributes {dimension_semantics = [#tpu.dimension_semantics<parallel>], iteration_bounds = array<i64: 1>, scalar_prefetch = 0 : i64, scratch_operands = 0 : i64, tpu.core_type = #tpu.core_type<tc>, window_params = [{transform_indices = @transform_0, window_bounds = array<i64: 16, 128>}, {pipeline_mode = #tpu.pipeline_mode<synchronous>, transform_indices = @transform_1, window_bounds = array<i64: 128, 128>}, {pipeline_mode = #tpu.pipeline_mode<synchronous>, transform_indices = @transform_2, window_bounds = array<i64: 1, 128>}, {pipeline_mode = #tpu.pipeline_mode<synchronous>, transform_indices = @transform_3, window_bounds = array<i64: 128, 128>}, {pipeline_mode = #tpu.pipeline_mode<synchronous>, transform_indices = @transform_4, window_bounds = array<i64: 3, 128>}, {transform_indices = @transform_5, window_bounds = array<i64: 16, 128>}]} {
    %c0 = arith.constant 0 : index
    %c0_0 = arith.constant 0 : index
    %0 = vector.load %arg1[%c0, %c0_0] : memref<16x128xf32, #tpu.memory_space<vmem>>, vector<16x128xf32>
    %c0_1 = arith.constant 0 : index
    %c0_2 = arith.constant 0 : index
    %1 = vector.load %arg2[%c0_1, %c0_2] : memref<128x128xf32, #tpu.memory_space<vmem>>, vector<128x128xf32>
    %cst = arith.constant dense<0.000000e+00> : vector<16x128xf32>
    %2 = tpu.matmul %0, %1, %cst {dimension_numbers = #tpu.dot_dimension_numbers<[1], [0], [0], [1], [0, 0, 1, 1], [], []>} : vector<16x128xf32>, vector<128x128xf32>, vector<16x128xf32> -> vector<16x128xf32>
    %c0_3 = arith.constant 0 : index
    %c0_4 = arith.constant 0 : index
    %3 = vector.load %arg3[%c0_3, %c0_4] : memref<1x128xf32, #tpu.memory_space<vmem>>, vector<1x128xf32>
    %4 = vector.broadcast %3 : vector<1x128xf32> to vector<16x128xf32>
    %5 = arith.addf %2, %4 : vector<16x128xf32>
    %cst_5 = arith.constant 0.000000e+00 : f32
    %6 = vector.broadcast %cst_5 : f32 to vector<16x128xf32>
    %7 = arith.maximumf %5, %6 : vector<16x128xf32>
    %c0_6 = arith.constant 0 : index
    %c0_7 = arith.constant 0 : index
    %8 = vector.load %arg4[%c0_6, %c0_7] : memref<128x128xf32, #tpu.memory_space<vmem>>, vector<128x128xf32>
    %cst_8 = arith.constant dense<0.000000e+00> : vector<16x128xf32>
    %9 = tpu.matmul %7, %8, %cst_8 {dimension_numbers = #tpu.dot_dimension_numbers<[1], [0], [0], [1], [0, 0, 1, 1], [], []>} : vector<16x128xf32>, vector<128x128xf32>, vector<16x128xf32> -> vector<16x128xf32>
    %c0_9 = arith.constant 0 : index
    %c0_10 = arith.constant 0 : index
    %10 = vector.load %arg5[%c0_9, %c0_10] : memref<3x128xf32, #tpu.memory_space<vmem>>, vector<3x128xf32>
    %11 = arith.addf %0, %9 : vector<16x128xf32>
    %12 = vector.extract_strided_slice %10 {offsets = [0, 0], sizes = [1, 128], strides = [1, 1]} : vector<3x128xf32> to vector<1x128xf32>
    %13 = vector.broadcast %12 : vector<1x128xf32> to vector<16x128xf32>
    %14 = arith.addf %11, %13 : vector<16x128xf32>
    %cst_11 = arith.constant dense<0.000000e+00> : vector<16xf32>
    %15 = vector.multi_reduction <add>, %14, %cst_11 [1] : vector<16x128xf32> to vector<16xf32>
    %16 = vector.shape_cast %15 : vector<16xf32> to vector<16x1xf32>
    %cst_12 = arith.constant 3.125000e-02 : f32
    %17 = vector.broadcast %cst_12 : f32 to vector<16x1xf32>
    %18 = arith.mulf %16, %17 : vector<16x1xf32>
    %19 = tpu.iota {dimensions = array<i32: 1>} : vector<16x128xi32>
    %c32_i32 = arith.constant 32 : i32
    %20 = vector.broadcast %c32_i32 : i32 to vector<16x128xi32>
    %21 = arith.cmpi slt, %19, %20 : vector<16x128xi32>
    %22 = vector.broadcast %18 : vector<16x1xf32> to vector<16x128xf32>
    %23 = arith.subf %14, %22 : vector<16x128xf32>
    %cst_13 = arith.constant 0.000000e+00 : f32
    %24 = vector.broadcast %cst_13 : f32 to vector<16x128xf32>
    %25 = arith.select %21, %23, %24 : vector<16x128xi1>, vector<16x128xf32>
    %26 = arith.mulf %25, %25 : vector<16x128xf32>
    %cst_14 = arith.constant dense<0.000000e+00> : vector<16xf32>
    %27 = vector.multi_reduction <add>, %26, %cst_14 [1] : vector<16x128xf32> to vector<16xf32>
    %28 = vector.shape_cast %27 : vector<16xf32> to vector<16x1xf32>
    %cst_15 = arith.constant 3.125000e-02 : f32
    %29 = vector.broadcast %cst_15 : f32 to vector<16x1xf32>
    %30 = arith.mulf %28, %29 : vector<16x1xf32>
    %cst_16 = arith.constant 9.99999997E-7 : f32
    %31 = vector.broadcast %cst_16 : f32 to vector<16x1xf32>
    %32 = arith.addf %30, %31 : vector<16x1xf32>
    %33 = math.rsqrt %32 : vector<16x1xf32>
    %34 = vector.broadcast %33 : vector<16x1xf32> to vector<16x128xf32>
    %35 = arith.mulf %25, %34 : vector<16x128xf32>
    %36 = vector.extract_strided_slice %10 {offsets = [1, 0], sizes = [1, 128], strides = [1, 1]} : vector<3x128xf32> to vector<1x128xf32>
    %37 = vector.broadcast %36 : vector<1x128xf32> to vector<16x128xf32>
    %38 = arith.mulf %35, %37 : vector<16x128xf32>
    %39 = vector.extract_strided_slice %10 {offsets = [2, 0], sizes = [1, 128], strides = [1, 1]} : vector<3x128xf32> to vector<1x128xf32>
    %40 = vector.broadcast %39 : vector<1x128xf32> to vector<16x128xf32>
    %41 = arith.addf %38, %40 : vector<16x128xf32>
    %c0_17 = arith.constant 0 : index
    %c0_18 = arith.constant 0 : index
    %42 = vector.load %arg6[%c0_17, %c0_18] : memref<16x128xf32, #tpu.memory_space<vmem>>, vector<16x128xf32>
    tpu.vector_store %arg6[%c0_17, %c0_18], %41 {strides = array<i32>} : memref<16x128xf32, #tpu.memory_space<vmem>>, vector<16x128xf32>,
    return
  }
  func.func @transform_0(%arg0: i32) -> (i32, i32) {
    %c0_i32 = arith.constant 0 : i32
    %c0_i32_0 = arith.constant 0 : i32
    return %arg0, %c0_i32 : i32, i32
  }
  func.func @transform_1(%arg0: i32) -> (i32, i32) {
    %c0_i32 = arith.constant 0 : i32
    %c0_i32_0 = arith.constant 0 : i32
    %c0_i32_1 = arith.constant 0 : i32
    return %c0_i32, %c0_i32_0 : i32, i32
  }
  func.func @transform_2(%arg0: i32) -> (i32, i32) {
    %c0_i32 = arith.constant 0 : i32
    %c0_i32_0 = arith.constant 0 : i32
    %c0_i32_1 = arith.constant 0 : i32
    return %c0_i32, %c0_i32_0 : i32, i32
  }
  func.func @transform_3(%arg0: i32) -> (i32, i32) {
    %c0_i32 = arith.constant 0 : i32
    %c0_i32_0 = arith.constant 0 : i32
    %c0_i32_1 = arith.constant 0 : i32
    return %c0_i32, %c0_i32_0 : i32, i32
  }
  func.func @transform_4(%arg0: i32) -> (i32, i32) {
    %c0_i32 = arith.constant 0 : i32
    %c0_i32_0 = arith.constant 0 : i32
    %c0_i32_1 = arith.constant 0 : i32
    return %c0_i32, %c0_i32_0 : i32, i32
  }
  func.func @transform_5(%arg0: i32) -> (i32, i32) {
    %c0_i32 = arith.constant 0 : i32
    %c0_i32_0 = arith.constant 0 : i32
    return %arg0, %c0_i32 : i32, i32
  }
}

</mosaic_0001>

<bundles_post_ra>
// kernel: tpu_custom_call.1
= control target key start
LH: loop header
LB: loop body
LE: loop exit
PB: predicated region body
PF: predicated region fallthrough
CT: control target
= control target key end

     0   :  { %10 = vsyncpa [#allocation3], 0  ;;  %s492_s0 = inlined_call_operand.hbm [shape: f32[16,128], index: 0, kind: input, shape index: {}]   ;;  %s493_s1 = inlined_call_operand.hbm [shape: f32[128,128], index: 1, kind: input, shape index: {}]   ;;  %s494_s2 = inlined_call_operand.vmem [shape: f32[1,128], index: 2, kind: input, shape index: {}]   ;;  %s495_s3 = inlined_call_operand.hbm [shape: f32[128,128], index: 3, kind: input, shape index: {}]   ;;  %s496_s4 = inlined_call_operand.hbm [shape: f32[3,128], index: 4, kind: input, shape index: {}]   ;;  %s497_s5 = inlined_call_operand.hbm [shape: f32[16,128], index: 5, kind: output, shape index: {}]  }
   0x1   :  { %11 = vsyncpa [#allocation6], 0 }
   0x2   :  { %12 = vsyncpa [#allocation9], 0 }
   0x3   :  { %13 = vsyncpa [#allocation4], 0  ;;  %s31_s20 = sshll.u32 %s493_s1, 4  ;;  %s420_s21 = smov [#allocation5]   ;;  %s32_s20 = int_to_ptr.hbm [resolvable:$true] %s31_s20 }
   0x4   :  { %s33_s22 = sshll.u32 %s420_s21, 4  ;;  %s18_s25 = sshll.u32 %s492_s0, 4  ;;  %s34_s22 = int_to_ptr.vmem [resolvable:$true] %s33_s22  ;;  %s19_s25 = int_to_ptr.hbm [resolvable:$true] %s18_s25 }
   0x5   :  { %s421_s26 = smov 128   ;;  %s422_s27 = smov 8  }
   0x6   :  { %39 = dma.hbm_to_vmem [thread:$0]  %s32_s20, 2048, %s34_s22, [#allocation6], %s421_s26, %s421_s26, %s422_s27  }
   0x7   :  { %s423_s28 = smov [#allocation2]   ;;  %s46_s1 = sshll.u32 %s495_s3, 4  ;;  %s47_s1 = int_to_ptr.hbm [resolvable:$true] %s46_s1 }
   0x8   :  { %s20_s29 = sshll.u32 %s423_s28, 4  ;;  %s60_s8 = sshll.u32 %s496_s4, 4  ;;  %s21_s29 = int_to_ptr.vmem [resolvable:$true] %s20_s29  ;;  %s61_s8 = int_to_ptr.hbm [resolvable:$true] %s60_s8 }
   0x9   :  { %26 = dma.hbm_to_vmem [thread:$0]  %s19_s25, 256, %s21_s29, [#allocation3], %s421_s26, %s421_s26, %s422_s27  }
   0xa   :  { %s424_s9 = smov [#allocation7]   ;;  %s425_s11 = smov [#allocation8]  }
   0xb   :  { %s48_s10 = sshll.u32 %s424_s9, 4  ;;  %s62_s3 = sshll.u32 %s425_s11, 4  ;;  %s49_s10 = int_to_ptr.vmem [resolvable:$true] %s48_s10  ;;  %s63_s3 = int_to_ptr.vmem [resolvable:$true] %s62_s3 }
   0xc   :  { %54 = dma.hbm_to_vmem [thread:$0]  %s47_s1, 2048, %s49_s10, [#allocation6], %s421_s26, %s421_s26, %s422_s27  }
   0xd   :  { %65 = dma.hbm_to_vmem [thread:$0]  %s61_s8, 64, %s63_s3, [#allocation9]  }
   0xe   :  { %412 = dma.done.wait [#allocation3], 256  }
   0xf   :  { %413 = vsyncadd [#allocation3], 4294967040 }
  0x10   :  { %414 = dma.done.wait [#allocation6], 4096  }
  0x11   :  { %415 = vsyncadd [#allocation6], 4294963200 }
  0x12   :  { %416 = dma.done.wait [#allocation9], 64  }
  0x13   :  { %417 = vsyncadd [#allocation9], 4294967232  ;;  %v99_v0 = vld [vmem:[#allocation5 + $0x78] sm:$0xff]  ;;  %v98_v1 = vld [vmem:[#allocation5 + $0x70] sm:$0xff]  ;;  %v180_v49 = vlaneseq  ;;  %s233_s16 = sshll.u32 %s497_s5, 4  ;;  %s234_s16 = int_to_ptr.hbm [resolvable:$true] %s233_s16 }
  0x14   :  { %104 = vmatpush.msra.mxu0 %v99_v0  ;;  %248 = vmatpush.msra.mxu2 %v99_v0  ;;  %v97_v2 = vld [vmem:[#allocation5 + $0x68] sm:$0xff]  ;;  %v96_v3 = vld [vmem:[#allocation5 + $0x60] sm:$0xff]  ;;  %v95_v4 = vld [vmem:[#allocation5 + $0x58] sm:$0xff] }
  0x15   :  { %v144_v5 = vld [vmem:[#allocation7 + $0x78] sm:$0xff]  ;;  %v143_v6 = vld [vmem:[#allocation7 + $0x70] sm:$0xff]  ;;  %v142_v8 = vld [vmem:[#allocation7 + $0x68] sm:$0xff]  ;;  %v181_v50 = vand.u32 127, %v180_v49 }
  0x16   :  { %105 = vmatpush.msra.mxu0 %v98_v1  ;;  %249 = vmatpush.msra.mxu2 %v98_v1  ;;  %v94_v7 = vld [vmem:[#allocation5 + $0x50] sm:$0xff]  ;;  %v93_v9 = vld [vmem:[#allocation5 + $0x48] sm:$0xff]  ;;  %v141_v10 = vld [vmem:[#allocation7 + $0x60] sm:$0xff] }
  0x17   :  { %145 = vmatpush.msra.mxu1 %v144_v5  ;;  %264 = vmatpush.msra.mxu3 %v144_v5  ;;  %v92_v11 = vld [vmem:[#allocation5 + $0x40] sm:$0xff]  ;;  %v140_v12 = vld [vmem:[#allocation7 + $0x58] sm:$0xff]  ;;  %v139_v14 = vld [vmem:[#allocation7 + $0x50] sm:$0xff]  ;;  %vm182_vm0 = vcmp.lt.s32.totalorder %v181_v50, 32 }
  0x18   :  { %106 = vmatpush.msra.mxu0 %v97_v2  ;;  %250 = vmatpush.msra.mxu2 %v97_v2  ;;  %v91_v13 = vld [vmem:[#allocation5 + $0x38] sm:$0xff]  ;;  %v90_v15 = vld [vmem:[#allocation5 + $0x30] sm:$0xff]  ;;  %v138_v16 = vld [vmem:[#allocation7 + $0x48] sm:$0xff] }
  0x19   :  { %146 = vmatpush.msra.mxu1 %v143_v6  ;;  %265 = vmatpush.msra.mxu3 %v143_v6  ;;  %v89_v17 = vld [vmem:[#allocation5 + $0x28] sm:$0xff]  ;;  %v137_v18 = vld [vmem:[#allocation7 + $0x40] sm:$0xff]  ;;  %v136_v20 = vld [vmem:[#allocation7 + $0x38] sm:$0xff] }
  0x1a   :  { %107 = vmatpush.msra.mxu0 %v96_v3  ;;  %251 = vmatpush.msra.mxu2 %v96_v3  ;;  %v88_v19 = vld [vmem:[#allocation5 + $0x20] sm:$0xff]  ;;  %v87_v21 = vld [vmem:[#allocation5 + $0x18] sm:$0xff]  ;;  %v135_v22 = vld [vmem:[#allocation7 + $0x30] sm:$0xff] }
  0x1b   :  { %147 = vmatpush.msra.mxu1 %v142_v8  ;;  %266 = vmatpush.msra.mxu3 %v142_v8  ;;  %v86_v23 = vld [vmem:[#allocation5 + $0x10] sm:$0xff]  ;;  %v134_v24 = vld [vmem:[#allocation7 + $0x28] sm:$0xff]  ;;  %v133_v26 = vld [vmem:[#allocation7 + $0x20] sm:$0xff] }
  0x1c   :  { %108 = vmatpush.msra.mxu0 %v95_v4  ;;  %252 = vmatpush.msra.mxu2 %v95_v4  ;;  %v85_v25 = vld [vmem:[#allocation5 + $0x8] sm:$0xff]  ;;  %v84_v27 = vld [vmem:[#allocation5] sm:$0xff]  ;;  %v82_v28 = vld [vmem:[#allocation2] sm:$0xff] }
  0x1d   :  { %148 = vmatpush.msra.mxu1 %v141_v10  ;;  %267 = vmatpush.msra.mxu3 %v141_v10  ;;  %v83_v29 = vld [vmem:[#allocation2 + $0x8] sm:$0xff]  ;;  %v131_v31 = vld [vmem:[#allocation7 + $0x10] sm:$0xff]  ;;  %v130_v32 = vld [vmem:[#allocation7 + $0x8] sm:$0xff] }
  0x1e   :  { %109 = vmatpush.msra.mxu0 %v94_v7  ;;  %253 = vmatpush.msra.mxu2 %v94_v7  ;;  %v132_v30 = vld [vmem:[#allocation7 + $0x18] sm:$0xff]  ;;  %v129_v33 = vld [vmem:[#allocation7] sm:$0xff]  ;;  %v287_v34 = vld [vmem:[%s494_s2] ss:$0 sm:$0xff]  ;;  %s426_s2 = smov [#allocation10]  }
  0x1f   :  { %149 = vmatpush.msra.mxu1 %v140_v12  ;;  %268 = vmatpush.msra.mxu3 %v140_v12  ;;  %v481_v41 = vld [vmem:[#allocation8] sm:$0x7]  ;;  %s231_s13 = sshll.u32 %s426_s2, 4  ;;  %s232_s13 = int_to_ptr.vmem [resolvable:$true] %s231_s13 }
  0x20   :  { %110 = vmatpush.msra.mxu0 %v93_v9  ;;  %254 = vmatpush.msra.mxu2 %v93_v9  ;;  %v171_v42 = vperm.slane %v481_v41, 0  ;;  %v219_v9 = vperm.slane %v481_v41, 1  ;;  %v222_v12 = vperm.slane %v481_v41, 2 }
  0x21   :  { %150 = vmatpush.msra.mxu1 %v139_v14  ;;  %269 = vmatpush.msra.mxu3 %v139_v14 }
  0x22   :  { %111 = vmatpush.msra.mxu0 %v92_v11  ;;  %255 = vmatpush.msra.mxu2 %v92_v11 }
  0x23   :  { %151 = vmatpush.msra.mxu1 %v138_v16  ;;  %270 = vmatpush.msra.mxu3 %v138_v16 }
  0x24   :  { %112 = vmatpush.msra.mxu0 %v91_v13  ;;  %256 = vmatpush.msra.mxu2 %v91_v13 }
  0x25   :  { %152 = vmatpush.msra.mxu1 %v137_v18  ;;  %271 = vmatpush.msra.mxu3 %v137_v18 }
  0x26   :  { %113 = vmatpush.msra.mxu0 %v90_v15  ;;  %257 = vmatpush.msra.mxu2 %v90_v15 }
  0x27   :  { %153 = vmatpush.msra.mxu1 %v136_v20  ;;  %272 = vmatpush.msra.mxu3 %v136_v20 }
  0x28   :  { %114 = vmatpush.msra.mxu0 %v89_v17  ;;  %258 = vmatpush.msra.mxu2 %v89_v17 }
  0x29   :  { %154 = vmatpush.msra.mxu1 %v135_v22  ;;  %273 = vmatpush.msra.mxu3 %v135_v22 }
  0x2a   :  { %115 = vmatpush.msra.mxu0 %v88_v19  ;;  %259 = vmatpush.msra.mxu2 %v88_v19 }
  0x2b   :  { %155 = vmatpush.msra.mxu1 %v134_v24  ;;  %274 = vmatpush.msra.mxu3 %v134_v24 }
  0x2c   :  { %116 = vmatpush.msra.mxu0 %v87_v21  ;;  %260 = vmatpush.msra.mxu2 %v87_v21 }
  0x2d   :  { %156 = vmatpush.msra.mxu1 %v133_v26  ;;  %275 = vmatpush.msra.mxu3 %v133_v26 }
  0x2e   :  { %117 = vmatpush.msra.mxu0 %v86_v23  ;;  %261 = vmatpush.msra.mxu2 %v86_v23 }
  0x2f   :  { %157 = vmatpush.msra.mxu1 %v132_v30  ;;  %276 = vmatpush.msra.mxu3 %v132_v30 }
  0x30   :  { %118 = vmatpush.msra.mxu0 %v85_v25  ;;  %262 = vmatpush.msra.mxu2 %v85_v25 }
  0x31   :  { %158 = vmatpush.msra.mxu1 %v131_v31  ;;  %277 = vmatpush.msra.mxu3 %v131_v31 }
  0x32   :  { %119 = vmatpush.msra.mxu0 %v84_v27  ;;  %263 = vmatpush.msra.mxu2 %v84_v27 }
  0x33   :  { %120 = vmatmul.f32.vlgmr.msra.gmra.mxu0 %v82_v28  ;;  %123 = vmatmul.f32.vlgmr.msra.gmra.mxu2 %v83_v29 }
  0x34   :  { %159 = vmatpush.msra.mxu1 %v130_v32  ;;  %278 = vmatpush.msra.mxu3 %v130_v32 }
  0x36   :  { %160 = vmatpush.msra.mxu1 %v129_v33  ;;  %279 = vmatpush.msra.mxu3 %v129_v33 }
  0xb0   :  { %v121_v35 = vpop.f32.mrf.mxu0 }
  0xb1   :  { %v122_v36 = vadd.f32 %v287_v34, %v121_v35 }
  0xb3   :  { %v127_v37 = vmax.f32 %v122_v36, 0.0 }
  0xb5   :  { %161 = vmatmul.f32.vlgmr.msra.gmra.mxu1 %v127_v37 }
  0xb6   :  { %v124_v38 = vpop.f32.mrf.mxu2 }
  0xb7   :  { %v125_v39 = vadd.f32 %v287_v34, %v124_v38 }
  0xb9   :  { %v128_v40 = vmax.f32 %v125_v39, 0.0 }
  0xbb   :  { %164 = vmatmul.f32.vlgmr.msra.gmra.mxu3 %v128_v40 }
 0x132   :  { %v162_v43 = vpop.f32.mrf.mxu1 }
 0x133   :  { %v169_v44 = vadd.f32 %v162_v43, %v82_v28 }
 0x135   :  { %v172_v45 = vadd.f32 %v171_v42, %v169_v44 }
 0x137   :  { %174 = vadd.xlane.f32.xlu0 %v172_v45 }
 0x13e   :  { %v165_v46 = vpop.f32.mrf.mxu3 }
 0x13f   :  { %v170_v47 = vadd.f32 %v165_v46, %v83_v29 }
 0x141   :  { %v173_v48 = vadd.f32 %v171_v42, %v170_v47 }
 0x143   :  { %176 = vadd.xlane.f32.xlu0 %v173_v48 }
 0x1aa   :  { %v175_v51 = vpop.xlane.xlu0 %174 }
 0x1ab   :  { %v178_v52 = vmul.f32 0.03125, %v175_v51 }
 0x1ad   :  { %v183_v53 = vsub.f32 %v172_v45, %v178_v52 }
 0x1af   :  { %v185_v54 = vsel %vm182_vm0, %v183_v53, 0.0 }
 0x1b0   :  { %v187_v55 = vmul.f32 %v185_v54, %v185_v54 }
 0x1b2   :  { %189 = vadd.xlane.f32.xlu1 %v187_v55 }
 0x1b6   :  { %v177_v56 = vpop.xlane.xlu0 %176 }
 0x1b7   :  { %v179_v57 = vmul.f32 0.03125, %v177_v56 }
 0x1b9   :  { %v184_v58 = vsub.f32 %v173_v48, %v179_v57 }
 0x1bb   :  { %v186_v59 = vsel %vm182_vm0, %v184_v58, 0.0 }
 0x1bc   :  { %v188_v60 = vmul.f32 %v186_v59, %v186_v59 }
 0x1be   :  { %191 = vadd.xlane.f32.xlu1 %v188_v60 }
 0x225   :  { %v190_v61 = vpop.xlane.xlu1 %189 }
 0x226   :  { %v193_v62 = vmul.f32 0.03125, %v190_v61 }
 0x228   :  { %v195_v63 = vadd.f32 1e-06, %v193_v62 }
 0x22a   :  { %288 = vrsqrt.f32 %v195_v63  ;;  %vm203_vm2 = vweird.f32 %v195_v63 }
 0x230   :  { %v289_v0 = vpop.eup %288 }
 0x231   :  { %v198_v1 = vmul.f32 %v289_v0, %v195_v63  ;;  %v192_v2 = vpop.xlane.xlu1 %191  ;;  %vm204_vm1 = vweird.f32 %v289_v0 }
 0x232   :  { %v194_v3 = vmul.f32 0.03125, %v192_v2  ;;  %vm205_vm3 = vmor %vm203_vm2, %vm204_vm1 }
 0x233   :  { %v199_v4 = vmul.f32 %v289_v0, %v198_v1 }
 0x234   :  { %v196_v5 = vadd.f32 1e-06, %v194_v3 }
 0x235   :  { %v200_v6 = vmul.f32 0.5, %v199_v4 }
 0x236   :  { %290 = vrsqrt.f32 %v196_v5  ;;  %vm213_vm5 = vweird.f32 %v196_v5 }
 0x237   :  { %v201_v7 = vsub.f32 1.5, %v200_v6 }
 0x239   :  { %v202_v8 = vmul.f32 %v289_v0, %v201_v7 }
 0x23b   :  { %v206_v10 = vsel %vm205_vm3, %v289_v0, %v202_v8 }
 0x23c   :  { %v291_v11 = vpop.eup %290  ;;  %v217_v13 = vmul.f32 %v206_v10, %v185_v54 }
 0x23d   :  { %v208_v14 = vmul.f32 %v291_v11, %v196_v5  ;;  %vm214_vm4 = vweird.f32 %v291_v11 }
 0x23e   :  { %v220_v15 = vmul.f32 %v219_v9, %v217_v13  ;;  %vm215_vm6 = vmor %vm213_vm5, %vm214_vm4 }
 0x23f   :  { %v209_v16 = vmul.f32 %v291_v11, %v208_v14 }
 0x240   :  { %v223_v17 = vadd.f32 %v222_v12, %v220_v15 }
 0x241   :  { %v210_v18 = vmul.f32 0.5, %v209_v16 }
 0x242   :  { %225 = vst [vmem:[#allocation10] sm:$0xff] %v223_v17 }
 0x243   :  { %v211_v19 = vsub.f32 1.5, %v210_v18 }
 0x245   :  { %v212_v20 = vmul.f32 %v291_v11, %v211_v19 }
 0x247   :  { %v216_v21 = vsel %vm215_vm6, %v291_v11, %v212_v20 }
 0x248   :  { %v218_v22 = vmul.f32 %v216_v21, %v186_v59 }
 0x24a   :  { %v221_v23 = vmul.f32 %v219_v9, %v218_v22 }
 0x24c   :  { %v224_v24 = vadd.f32 %v222_v12, %v221_v23 }
 0x24e   :  { %226 = vst [vmem:[#allocation10 + $0x8] sm:$0xff] %v224_v24 }
 0x24f   :  { %239 = dma.vmem_to_hbm [thread:$0]  %s232_s13, 256, %s234_s16, [#allocation4], %s421_s26, %s421_s26, %s422_s27  }
 0x250   :  { %418 = dma.done.wait [#allocation4], 256  }
 0x251   :  { %419 = vsyncadd [#allocation4], 4294967040 }
 0x252   :  { %244 = vsyncpa [#allocation3], 1 }
 0x253   :  { %245 = vsyncpa [#allocation6], 1 }
 0x254   :  { %246 = vsyncpa [#allocation9], 1 }
 0x255   :  { %247 = vsyncpa [#allocation4], 1 }

// kernel: tpu_custom_call.1
= control target key start
LH: loop header
LB: loop body
LE: loop exit
PB: predicated region body
PF: predicated region fallthrough
CT: control target
= control target key end

     0   :  { %10 = vsyncpa [#allocation3], 0  ;;  %s492_s0 = inlined_call_operand.hbm [shape: f32[16,128], index: 0, kind: input, shape index: {}]   ;;  %s493_s1 = inlined_call_operand.hbm [shape: f32[128,128], index: 1, kind: input, shape index: {}]   ;;  %s494_s2 = inlined_call_operand.vmem [shape: f32[1,128], index: 2, kind: input, shape index: {}]   ;;  %s495_s3 = inlined_call_operand.hbm [shape: f32[128,128], index: 3, kind: input, shape index: {}]   ;;  %s496_s4 = inlined_call_operand.hbm [shape: f32[3,128], index: 4, kind: input, shape index: {}]   ;;  %s497_s5 = inlined_call_operand.hbm [shape: f32[16,128], index: 5, kind: output, shape index: {}]  }
   0x1   :  { %11 = vsyncpa [#allocation6], 0 }
   0x2   :  { %12 = vsyncpa [#allocation9], 0 }
   0x3   :  { %13 = vsyncpa [#allocation4], 0  ;;  %s31_s20 = sshll.u32 %s493_s1, 4  ;;  %s420_s21 = smov [#allocation5]   ;;  %s32_s20 = int_to_ptr.hbm [resolvable:$true] %s31_s20 }
   0x4   :  { %s33_s22 = sshll.u32 %s420_s21, 4  ;;  %s18_s25 = sshll.u32 %s492_s0, 4  ;;  %s34_s22 = int_to_ptr.vmem [resolvable:$true] %s33_s22  ;;  %s19_s25 = int_to_ptr.hbm [resolvable:$true] %s18_s25 }
   0x5   :  { %s421_s26 = smov 128   ;;  %s422_s27 = smov 8  }
   0x6   :  { %39 = dma.hbm_to_vmem [thread:$0]  %s32_s20, 2048, %s34_s22, [#allocation6], %s421_s26, %s421_s26, %s422_s27  }
   0x7   :  { %s423_s28 = smov [#allocation2]   ;;  %s46_s1 = sshll.u32 %s495_s3, 4  ;;  %s47_s1 = int_to_ptr.hbm [resolvable:$true] %s46_s1 }
   0x8   :  { %s20_s29 = sshll.u32 %s423_s28, 4  ;;  %s60_s8 = sshll.u32 %s496_s4, 4  ;;  %s21_s29 = int_to_ptr.vmem [resolvable:$true] %s20_s29  ;;  %s61_s8 = int_to_ptr.hbm [resolvable:$true] %s60_s8 }
   0x9   :  { %26 = dma.hbm_to_vmem [thread:$0]  %s19_s25, 256, %s21_s29, [#allocation3], %s421_s26, %s421_s26, %s422_s27  }
   0xa   :  { %s424_s9 = smov [#allocation7]   ;;  %s425_s11 = smov [#allocation8]  }
   0xb   :  { %s48_s10 = sshll.u32 %s424_s9, 4  ;;  %s62_s3 = sshll.u32 %s425_s11, 4  ;;  %s49_s10 = int_to_ptr.vmem [resolvable:$true] %s48_s10  ;;  %s63_s3 = int_to_ptr.vmem [resolvable:$true] %s62_s3 }
   0xc   :  { %54 = dma.hbm_to_vmem [thread:$0]  %s47_s1, 2048, %s49_s10, [#allocation6], %s421_s26, %s421_s26, %s422_s27  }
   0xd   :  { %65 = dma.hbm_to_vmem [thread:$0]  %s61_s8, 64, %s63_s3, [#allocation9]  }
   0xe   :  { %412 = dma.done.wait [#allocation3], 256  }
   0xf   :  { %413 = vsyncadd [#allocation3], 4294967040 }
  0x10   :  { %414 = dma.done.wait [#allocation6], 4096  }
  0x11   :  { %415 = vsyncadd [#allocation6], 4294963200 }
  0x12   :  { %416 = dma.done.wait [#allocation9], 64  }
  0x13   :  { %417 = vsyncadd [#allocation9], 4294967232  ;;  %v99_v0 = vld [vmem:[#allocation5 + $0x78] sm:$0xff]  ;;  %v98_v1 = vld [vmem:[#allocation5 + $0x70] sm:$0xff]  ;;  %v180_v49 = vlaneseq  ;;  %s233_s16 = sshll.u32 %s497_s5, 4  ;;  %s234_s16 = int_to_ptr.hbm [resolvable:$true] %s233_s16 }
  0x14   :  { %104 = vmatpush.msra.mxu0 %v99_v0  ;;  %248 = vmatpush.msra.mxu2 %v99_v0  ;;  %v97_v2 = vld [vmem:[#allocation5 + $0x68] sm:$0xff]  ;;  %v96_v3 = vld [vmem:[#allocation5 + $0x60] sm:$0xff]  ;;  %v95_v4 = vld [vmem:[#allocation5 + $0x58] sm:$0xff] }
  0x15   :  { %v144_v5 = vld [vmem:[#allocation7 + $0x78] sm:$0xff]  ;;  %v143_v6 = vld [vmem:[#allocation7 + $0x70] sm:$0xff]  ;;  %v142_v8 = vld [vmem:[#allocation7 + $0x68] sm:$0xff]  ;;  %v181_v50 = vand.u32 127, %v180_v49 }
  0x16   :  { %105 = vmatpush.msra.mxu0 %v98_v1  ;;  %249 = vmatpush.msra.mxu2 %v98_v1  ;;  %v94_v7 = vld [vmem:[#allocation5 + $0x50] sm:$0xff]  ;;  %v93_v9 = vld [vmem:[#allocation5 + $0x48] sm:$0xff]  ;;  %v141_v10 = vld [vmem:[#allocation7 + $0x60] sm:$0xff] }
  0x17   :  { %145 = vmatpush.msra.mxu1 %v144_v5  ;;  %264 = vmatpush.msra.mxu3 %v144_v5  ;;  %v92_v11 = vld [vmem:[#allocation5 + $0x40] sm:$0xff]  ;;  %v140_v12 = vld [vmem:[#allocation7 + $0x58] sm:$0xff]  ;;  %v139_v14 = vld [vmem:[#allocation7 + $0x50] sm:$0xff]  ;;  %vm182_vm0 = vcmp.lt.s32.totalorder %v181_v50, 32 }
  0x18   :  { %106 = vmatpush.msra.mxu0 %v97_v2  ;;  %250 = vmatpush.msra.mxu2 %v97_v2  ;;  %v91_v13 = vld [vmem:[#allocation5 + $0x38] sm:$0xff]  ;;  %v90_v15 = vld [vmem:[#allocation5 + $0x30] sm:$0xff]  ;;  %v138_v16 = vld [vmem:[#allocation7 + $0x48] sm:$0xff] }
  0x19   :  { %146 = vmatpush.msra.mxu1 %v143_v6  ;;  %265 = vmatpush.msra.mxu3 %v143_v6  ;;  %v89_v17 = vld [vmem:[#allocation5 + $0x28] sm:$0xff]  ;;  %v137_v18 = vld [vmem:[#allocation7 + $0x40] sm:$0xff]  ;;  %v136_v20 = vld [vmem:[#allocation7 + $0x38] sm:$0xff] }
  0x1a   :  { %107 = vmatpush.msra.mxu0 %v96_v3  ;;  %251 = vmatpush.msra.mxu2 %v96_v3  ;;  %v88_v19 = vld [vmem:[#allocation5 + $0x20] sm:$0xff]  ;;  %v87_v21 = vld [vmem:[#allocation5 + $0x18] sm:$0xff]  ;;  %v135_v22 = vld [vmem:[#allocation7 + $0x30] sm:$0xff] }
  0x1b   :  { %147 = vmatpush.msra.mxu1 %v142_v8  ;;  %266 = vmatpush.msra.mxu3 %v142_v8  ;;  %v86_v23 = vld [vmem:[#allocation5 + $0x10] sm:$0xff]  ;;  %v134_v24 = vld [vmem:[#allocation7 + $0x28] sm:$0xff]  ;;  %v133_v26 = vld [vmem:[#allocation7 + $0x20] sm:$0xff] }
  0x1c   :  { %108 = vmatpush.msra.mxu0 %v95_v4  ;;  %252 = vmatpush.msra.mxu2 %v95_v4  ;;  %v85_v25 = vld [vmem:[#allocation5 + $0x8] sm:$0xff]  ;;  %v84_v27 = vld [vmem:[#allocation5] sm:$0xff]  ;;  %v82_v28 = vld [vmem:[#allocation2] sm:$0xff] }
  0x1d   :  { %148 = vmatpush.msra.mxu1 %v141_v10  ;;  %267 = vmatpush.msra.mxu3 %v141_v10  ;;  %v83_v29 = vld [vmem:[#allocation2 + $0x8] sm:$0xff]  ;;  %v131_v31 = vld [vmem:[#allocation7 + $0x10] sm:$0xff]  ;;  %v130_v32 = vld [vmem:[#allocation7 + $0x8] sm:$0xff] }
  0x1e   :  { %109 = vmatpush.msra.mxu0 %v94_v7  ;;  %253 = vmatpush.msra.mxu2 %v94_v7  ;;  %v132_v30 = vld [vmem:[#allocation7 + $0x18] sm:$0xff]  ;;  %v129_v33 = vld [vmem:[#allocation7] sm:$0xff]  ;;  %v287_v34 = vld [vmem:[%s494_s2] ss:$0 sm:$0xff]  ;;  %s426_s2 = smov [#allocation10]  }
  0x1f   :  { %149 = vmatpush.msra.mxu1 %v140_v12  ;;  %268 = vmatpush.msra.mxu3 %v140_v12  ;;  %v481_v41 = vld [vmem:[#allocation8] sm:$0x7]  ;;  %s231_s13 = sshll.u32 %s426_s2, 4  ;;  %s232_s13 = int_to_ptr.vmem [resolvable:$true] %s231_s13 }
  0x20   :  { %110 = vmatpush.msra.mxu0 %v93_v9  ;;  %254 = vmatpush.msra.mxu2 %v93_v9  ;;  %v171_v42 = vperm.slane %v481_v41, 0  ;;  %v219_v9 = vperm.slane %v481_v41, 1  ;;  %v222_v12 = vperm.slane %v481_v41, 2 }
  0x21   :  { %150 = vmatpush.msra.mxu1 %v139_v14  ;;  %269 = vmatpush.msra.mxu3 %v139_v14 }
  0x22   :  { %111 = vmatpush.msra.mxu0 %v92_v11  ;;  %255 = vmatpush.msra.mxu2 %v92_v11 }
  0x23   :  { %151 = vmatpush.msra.mxu1 %v138_v16  ;;  %270 = vmatpush.msra.mxu3 %v138_v16 }
  0x24   :  { %112 = vmatpush.msra.mxu0 %v91_v13  ;;  %256 = vmatpush.msra.mxu2 %v91_v13 }
  0x25   :  { %152 = vmatpush.msra.mxu1 %v137_v18  ;;  %271 = vmatpush.msra.mxu3 %v137_v18 }
  0x26   :  { %113 = vmatpush.msra.mxu0 %v90_v15  ;;  %257 = vmatpush.msra.mxu2 %v90_v15 }
  0x27   :  { %153 = vmatpush.msra.mxu1 %v136_v20  ;;  %272 = vmatpush.msra.mxu3 %v136_v20 }
  0x28   :  { %114 = vmatpush.msra.mxu0 %v89_v17  ;;  %258 = vmatpush.msra.mxu2 %v89_v17 }
  0x29   :  { %154 = vmatpush.msra.mxu1 %v135_v22  ;;  %273 = vmatpush.msra.mxu3 %v135_v22 }
  0x2a   :  { %115 = vmatpush.msra.mxu0 %v88_v19  ;;  %259 = vmatpush.msra.mxu2 %v88_v19 }
  0x2b   :  { %155 = vmatpush.msra.mxu1 %v134_v24  ;;  %274 = vmatpush.msra.mxu3 %v134_v24 }
  0x2c   :  { %116 = vmatpush.msra.mxu0 %v87_v21  ;;  %260 = vmatpush.msra.mxu2 %v87_v21 }
  0x2d   :  { %156 = vmatpush.msra.mxu1 %v133_v26  ;;  %275 = vmatpush.msra.mxu3 %v133_v26 }
  0x2e   :  { %117 = vmatpush.msra.mxu0 %v86_v23  ;;  %261 = vmatpush.msra.mxu2 %v86_v23 }
  0x2f   :  { %157 = vmatpush.msra.mxu1 %v132_v30  ;;  %276 = vmatpush.msra.mxu3 %v132_v30 }
  0x30   :  { %118 = vmatpush.msra.mxu0 %v85_v25  ;;  %262 = vmatpush.msra.mxu2 %v85_v25 }
  0x31   :  { %158 = vmatpush.msra.mxu1 %v131_v31  ;;  %277 = vmatpush.msra.mxu3 %v131_v31 }
  0x32   :  { %119 = vmatpush.msra.mxu0 %v84_v27  ;;  %263 = vmatpush.msra.mxu2 %v84_v27 }
  0x33   :  { %120 = vmatmul.f32.vlgmr.msra.gmra.mxu0 %v82_v28  ;;  %123 = vmatmul.f32.vlgmr.msra.gmra.mxu2 %v83_v29 }
  0x34   :  { %159 = vmatpush.msra.mxu1 %v130_v32  ;;  %278 = vmatpush.msra.mxu3 %v130_v32 }
  0x36   :  { %160 = vmatpush.msra.mxu1 %v129_v33  ;;  %279 = vmatpush.msra.mxu3 %v129_v33 }
  0xb0   :  { %v121_v35 = vpop.f32.mrf.mxu0 }
  0xb1   :  { %v122_v36 = vadd.f32 %v287_v34, %v121_v35 }
  0xb3   :  { %v127_v37 = vmax.f32 %v122_v36, 0.0 }
  0xb5   :  { %161 = vmatmul.f32.vlgmr.msra.gmra.mxu1 %v127_v37 }
  0xb6   :  { %v124_v38 = vpop.f32.mrf.mxu2 }
  0xb7   :  { %v125_v39 = vadd.f32 %v287_v34, %v124_v38 }
  0xb9   :  { %v128_v40 = vmax.f32 %v125_v39, 0.0 }
  0xbb   :  { %164 = vmatmul.f32.vlgmr.msra.gmra.mxu3 %v128_v40 }
 0x132   :  { %v162_v43 = vpop.f32.mrf.mxu1 }
 0x133   :  { %v169_v44 = vadd.f32 %v162_v43, %v82_v28 }
 0x135   :  { %v172_v45 = vadd.f32 %v171_v42, %v169_v44 }
 0x137   :  { %174 = vadd.xlane.f32.xlu0 %v172_v45 }
 0x13e   :  { %v165_v46 = vpop.f32.mrf.mxu3 }
 0x13f   :  { %v170_v47 = vadd.f32 %v165_v46, %v83_v29 }
 0x141   :  { %v173_v48 = vadd.f32 %v171_v42, %v170_v47 }
 0x143   :  { %176 = vadd.xlane.f32.xlu0 %v173_v48 }
 0x1aa   :  { %v175_v51 = vpop.xlane.xlu0 %174 }
 0x1ab   :  { %v178_v52 = vmul.f32 0.03125, %v175_v51 }
 0x1ad   :  { %v183_v53 = vsub.f32 %v172_v45, %v178_v52 }
 0x1af   :  { %v185_v54 = vsel %vm182_vm0, %v183_v53, 0.0 }
 0x1b0   :  { %v187_v55 = vmul.f32 %v185_v54, %v185_v54 }
 0x1b2   :  { %189 = vadd.xlane.f32.xlu1 %v187_v55 }
 0x1b6   :  { %v177_v56 = vpop.xlane.xlu0 %176 }
 0x1b7   :  { %v179_v57 = vmul.f32 0.03125, %v177_v56 }
 0x1b9   :  { %v184_v58 = vsub.f32 %v173_v48, %v179_v57 }
 0x1bb   :  { %v186_v59 = vsel %vm182_vm0, %v184_v58, 0.0 }
 0x1bc   :  { %v188_v60 = vmul.f32 %v186_v59, %v186_v59 }
 0x1be   :  { %191 = vadd.xlane.f32.xlu1 %v188_v60 }
 0x225   :  { %v190_v61 = vpop.xlane.xlu1 %189 }
 0x226   :  { %v193_v62 = vmul.f32 0.03125, %v190_v61 }
 0x228   :  { %v195_v63 = vadd.f32 1e-06, %v193_v62 }
 0x22a   :  { %288 = vrsqrt.f32 %v195_v63  ;;  %vm203_vm2 = vweird.f32 %v195_v63 }
 0x230   :  { %v289_v0 = vpop.eup %288 }
 0x231   :  { %v198_v1 = vmul.f32 %v289_v0, %v195_v63  ;;  %v192_v2 = vpop.xlane.xlu1 %191  ;;  %vm204_vm1 = vweird.f32 %v289_v0 }
 0x232   :  { %v194_v3 = vmul.f32 0.03125, %v192_v2  ;;  %vm205_vm3 = vmor %vm203_vm2, %vm204_vm1 }
 0x233   :  { %v199_v4 = vmul.f32 %v289_v0, %v198_v1 }
 0x234   :  { %v196_v5 = vadd.f32 1e-06, %v194_v3 }
 0x235   :  { %v200_v6 = vmul.f32 0.5, %v199_v4 }
 0x236   :  { %290 = vrsqrt.f32 %v196_v5  ;;  %vm213_vm5 = vweird.f32 %v196_v5 }
 0x237   :  { %v201_v7 = vsub.f32 1.5, %v200_v6 }
 0x239   :  { %v202_v8 = vmul.f32 %v289_v0, %v201_v7 }
 0x23b   :  { %v206_v10 = vsel %vm205_vm3, %v289_v0, %v202_v8 }
 0x23c   :  { %v291_v11 = vpop.eup %290  ;;  %v217_v13 = vmul.f32 %v206_v10, %v185_v54 }
 0x23d   :  { %v208_v14 = vmul.f32 %v291_v11, %v196_v5  ;;  %vm214_vm4 = vweird.f32 %v291_v11 }
 0x23e   :  { %v220_v15 = vmul.f32 %v219_v9, %v217_v13  ;;  %vm215_vm6 = vmor %vm213_vm5, %vm214_vm4 }
 0x23f   :  { %v209_v16 = vmul.f32 %v291_v11, %v208_v14 }
 0x240   :  { %v223_v17 = vadd.f32 %v222_v12, %v220_v15 }
 0x241   :  { %v210_v18 = vmul.f32 0.5, %v209_v16 }
 0x242   :  { %225 = vst [vmem:[#allocation10] sm:$0xff] %v223_v17 }
 0x243   :  { %v211_v19 = vsub.f32 1.5, %v210_v18 }
 0x245   :  { %v212_v20 = vmul.f32 %v291_v11, %v211_v19 }
 0x247   :  { %v216_v21 = vsel %vm215_vm6, %v291_v11, %v212_v20 }
 0x248   :  { %v218_v22 = vmul.f32 %v216_v21, %v186_v59 }
 0x24a   :  { %v221_v23 = vmul.f32 %v219_v9, %v218_v22 }
 0x24c   :  { %v224_v24 = vadd.f32 %v222_v12, %v221_v23 }
 0x24e   :  { %226 = vst [vmem:[#allocation10 + $0x8] sm:$0xff] %v224_v24 }
 0x24f   :  { %239 = dma.vmem_to_hbm [thread:$0]  %s232_s13, 256, %s234_s16, [#allocation4], %s421_s26, %s421_s26, %s422_s27  }
 0x250   :  { %418 = dma.done.wait [#allocation4], 256  }
 0x251   :  { %419 = vsyncadd [#allocation4], 4294967040 }
 0x252   :  { %244 = vsyncpa [#allocation3], 1 }
 0x253   :  { %245 = vsyncpa [#allocation6], 1 }
 0x254   :  { %246 = vsyncpa [#allocation9], 1 }
 0x255   :  { %247 = vsyncpa [#allocation4], 1 }

</bundles_post_ra>
